<compile_context>
chip_gen: v6e
topology: v6e:2x2x1
jax: 0.10.0
libtpu: 0.0.40
codegen_flags: <defaults>
</compile_context>

<pallas_src>
import numpy as np

import jax
import jax.numpy as jnp
from jax import lax
from jax.experimental import pallas as pl
from jax.experimental.pallas import tpu as pltpu


# Tap order; tap k corresponds to conv kernel position (kh, kw) = (dy + 1, dx + 1).
_TAPS = tuple((dy, dx) for dy in (-1, 0, 1) for dx in (-1, 0, 1))


# ----------------------------- Pallas kernel -------------------------------

def _make_sdi_kernel(C, TH, W):
    C4 = 4 * C
    THW = TH * W
    L = THW + 2 * W          # [halo_top row | TH tile rows | halo_bot row], flattened

    def kernel(xc_ref, ht_ref, hb_ref, w_ref, b_ref, o_ref, full_ref):
        # xc_ref  : (1, 4C, TH*W) bf16   channel-packed features, current row tile
        # ht_ref  : (1, 1, 4C, W) bf16   row above the tile (zeros at image top)
        # hb_ref  : (1, 1, 4C, W) bf16   row below the tile (zeros at image bottom)
        # w_ref   : (9, 4C, 4C)   bf16   per-tap block-diagonal weights [k, co, ci]
        # b_ref   : (4C, 1)       f32    biases (one group of C rows per conv)
        # o_ref   : (1, C, TH*W)         product of the four conv outputs
        # full_ref: VMEM scratch (4C, L) bf16  halo'd tile, row-major flattened

        # Assemble the halo'd tile in scratch at static lane offsets 0, W, W+THW.
        full_ref[:, 0:W] = ht_ref[0, 0]
        full_ref[:, W:W + THW] = xc_ref[0]
        full_ref[:, W + THW:L] = hb_ref[0, 0]
        full = full_ref[...]

        # Column-in-row index (cheap VPU work, hides under the MXU).
        col = lax.broadcasted_iota(jnp.int32, (C4, L), 1) % W
        zeros = jnp.zeros_like(full)

        # dx-shifted variants.  For a (+1) column shift the source column 0 of
        # every row is never legitimately read (it only appears through the flat
        # wrap into the next row), so zeroing it makes the single lane shift
        # exact; likewise column W-1 for the (-1) shift.  The rotation wrap also
        # lands on a zeroed position.  Only these two shifted copies are
        # lane-misaligned; all dy taps below are slices at multiples of W.
        m_r = jnp.where(col != 0, full, zeros)          # used for dx = +1
        m_l = jnp.where(col != W - 1, full, zeros)      # used for dx = -1
        var_p = jnp.concatenate([m_r[:, 1:], m_r[:, :1]], axis=1)           # [q] = m_r[q+1]
        var_m = jnp.concatenate([m_l[:, L - 1:], m_l[:, :L - 1]], axis=1)   # [q] = m_l[q-1]
        variants = {0: full, 1: var_p, -1: var_m}

        # 9 per-tap matmuls accumulated in f32 -- no materialized im2col buffer.
        acc = jnp.zeros((C4, THW), jnp.float32)
        for k, (dy, dx) in enumerate(_TAPS):
            start = (1 + dy) * W                         # static, multiple of W
            src = variants[dx][:, start:start + THW]     # (4C, TH*W) bf16
            acc = acc + jnp.dot(w_ref[k], src,
                                preferred_element_type=jnp.float32)
        acc = acc + b_ref[...]                           # bias per conv/channel

        out = acc[0:C] * acc[C:2 * C] * acc[2 * C:3 * C] * acc[3 * C:4 * C]
        o_ref[0] = out.astype(o_ref.dtype)

    return kernel


def _choose_row_tile(H, W):
    # TH rows per grid step; keep TH*W a multiple of 128 when possible.
    for th in (8, 16, 4, 2):
        if H % th == 0 and (th * W) % 128 == 0:
            return th
    return H


def prepare_sdi_params(weights, biases):
    """weights[i]: (3, 3, Cin, Cout) HWIO; biases[i]: (Cout,).
    Returns (w_taps (9,4C,4C) bf16 block-diagonal, bias (4C,1) f32).
    Call once per parameter set (hoisted out of the per-forward path)."""
    C = weights[0].shape[-1]
    C4 = 4 * C
    w_taps = jnp.zeros((9, C4, C4), jnp.float32)
    for g, w in enumerate(weights):
        wg = jnp.transpose(w, (0, 1, 3, 2)).reshape(9, C, C)   # [k, co, ci]
        w_taps = w_taps.at[:, g * C:(g + 1) * C, g * C:(g + 1) * C].set(wg)
    w_taps = w_taps.astype(jnp.bfloat16)
    ball = jnp.concatenate([jnp.ravel(b) for b in biases]).reshape(C4, 1)
    return w_taps, ball.astype(jnp.float32)


def _sdi_pallas(xs_resized, w_taps, bias, out_dtype=jnp.float32):
    """xs_resized: 4 arrays (N, C, H, W) f32 already resized to the anchor size."""
    N, C, H, W = xs_resized[0].shape
    C4 = 4 * C
    TH = _choose_row_tile(H, W)
    T = H // TH
    THW = TH * W

    # Channel-pack the four features; keep C a multiple of 16 in real configs
    # (C=48 is; 4C keeps the packed axis sublane-aligned at the demo size too).
    xcat = jnp.concatenate(xs_resized, axis=1).astype(jnp.bfloat16)   # (N, 4C, H, W)

    # Per-tile halo rows, zeroed at the image border (so the kernel needs no row
    # masks and never re-reads neighbour tiles).
    idx_top = np.arange(T) * TH - 1
    idx_bot = (np.arange(T) + 1) * TH
    ht = xcat[:, :, np.clip(idx_top, 0, H - 1), :]                    # (N, 4C, T, W)
    hb = xcat[:, :, np.clip(idx_bot, 0, H - 1), :]
    ht = ht * jnp.asarray(idx_top >= 0, jnp.bfloat16).reshape(1, 1, T, 1)
    hb = hb * jnp.asarray(idx_bot <= H - 1, jnp.bfloat16).reshape(1, 1, T, 1)
    ht = jnp.transpose(ht, (0, 2, 1, 3))                              # (N, T, 4C, W)
    hb = jnp.transpose(hb, (0, 2, 1, 3))

    xflat = xcat.reshape(N, C4, H * W)

    kernel = _make_sdi_kernel(C, TH, W)

    flops = 2 * 9 * C4 * C4 * H * W * N
    bytes_accessed = int(xflat.size * 2 + ht.size * 2 + hb.size * 2
                         + w_taps.size * 2 + bias.size * 4
                         + N * C * H * W * jnp.dtype(out_dtype).itemsize)

    out = pl.pallas_call(
        kernel,
        out_shape=jax.ShapeDtypeStruct((N, C, H * W), out_dtype),
        grid_spec=pltpu.PrefetchScalarGridSpec(
            num_scalar_prefetch=0,
            grid=(N, T),
            in_specs=[
                pl.BlockSpec((1, C4, THW), lambda n, t: (n, 0, t)),
                pl.BlockSpec((1, 1, C4, W), lambda n, t: (n, t, 0, 0)),
                pl.BlockSpec((1, 1, C4, W), lambda n, t: (n, t, 0, 0)),
                pl.BlockSpec((9, C4, C4), lambda n, t: (0, 0, 0)),   # grid-invariant
                pl.BlockSpec((C4, 1), lambda n, t: (0, 0)),          # grid-invariant
            ],
            out_specs=pl.BlockSpec((1, C, THW), lambda n, t: (n, 0, t)),
            scratch_shapes=[pltpu.VMEM((C4, THW + 2 * W), jnp.bfloat16)],
        ),
        compiler_params=pltpu.CompilerParams(
            dimension_semantics=("parallel", "parallel"),
            vmem_limit_bytes=32 * 1024 * 1024),
        cost_estimate=pl.CostEstimate(flops=flops, transcendentals=0,
                                      bytes_accessed=bytes_accessed),
    )(xflat, ht, hb, w_taps, bias)

    return out.reshape(N, C, H, W)


# --------------------------- resize glue (JAX, NCHW) -------------------------

def adaptive_avg_pool2d_nchw(x, out_h, out_w):
    """PyTorch-style adaptive average pooling, NCHW."""
    N, C, H, W = x.shape
    if H % out_h == 0 and W % out_w == 0:
        return x.reshape(N, C, out_h, H // out_h, out_w, W // out_w).mean(axis=(3, 5))
    rows = []
    for i in range(out_h):
        h0 = (i * H) // out_h
        h1 = -((-(i + 1) * H) // out_h)
        cols = []
        for j in range(out_w):
            w0 = (j * W) // out_w
            w1 = -((-(j + 1) * W) // out_w)
            cols.append(jnp.mean(x[:, :, h0:h1, w0:w1], axis=(2, 3)))
        rows.append(jnp.stack(cols, axis=-1))
    return jnp.stack(rows, axis=-2)


def bilinear_resize_nchw_align_corners(x, out_h, out_w):
    """F.interpolate(mode='bilinear', align_corners=True) equivalent, NCHW."""
    N, C, H, W = x.shape

    def coords(in_size, out_size):
        if out_size == 1 or in_size == 1:
            src = jnp.zeros((out_size,), jnp.float32)
        else:
            src = jnp.arange(out_size, dtype=jnp.float32) * (
                (in_size - 1) / (out_size - 1))
        lo = jnp.clip(jnp.floor(src).astype(jnp.int32), 0, in_size - 1)
        hi = jnp.minimum(lo + 1, in_size - 1)
        frac = src - lo.astype(jnp.float32)
        return lo, hi, frac

    y0, y1, fy = coords(H, out_h)
    x0, x1, fx = coords(W, out_w)
    top = x[:, :, y0, :]
    bot = x[:, :, y1, :]
    rows = top * (1.0 - fy)[None, None, :, None] + bot * fy[None, None, :, None]
    left = rows[:, :, :, x0]
    right = rows[:, :, :, x1]
    return (left * (1.0 - fx)[None, None, None, :]
            + right * fx[None, None, None, :])


def _resize_to(x_nchw, target):
    x = x_nchw.astype(jnp.float32)
    s = x_nchw.shape[-1]
    if s > target:
        x = adaptive_avg_pool2d_nchw(x, target, target)
    elif s < target:
        x = bilinear_resize_nchw_align_corners(x, target, target)
    return x


# ------------------------------ SDI forward ---------------------------------

def sdi_forward(xs_nchw, anchor_nchw, weights, biases, out_dtype=jnp.float32):
    """xs_nchw: list of 4 (N, C, Hi, Wi); anchor_nchw: (N, C, H, W).
    weights[i]: (3, 3, Cin, Cout) HWIO;  biases[i]: (Cout,).
    Returns (N, C, H, W), matching SDI.forward of the PyTorch module."""
    target = anchor_nchw.shape[-1]
    resized = [_resize_to(x, target) for x in xs_nchw]
    w_taps, bias = prepare_sdi_params(weights, biases)
    return _sdi_pallas(resized, w_taps, bias, out_dtype)


def reference_forward(xs_nchw, anchor_nchw, weights, biases):
    """Pure-JAX reference using the same bf16 operands + f32 accumulation."""
    target = anchor_nchw.shape[-1]
    N, C = anchor_nchw.shape[0], anchor_nchw.shape[1]
    ans = jnp.ones((N, C, target, target), jnp.float32)
    for x, w, b in zip(xs_nchw, weights, biases):
        xr = _resize_to(x, target).astype(jnp.bfloat16)
        y = lax.conv_general_dilated(
            xr, w.astype(jnp.bfloat16), (1, 1), 'SAME',
            dimension_numbers=('NCHW', 'HWIO', 'NCHW'),
            preferred_element_type=jnp.float32)
        ans = ans * (y + b[None, :, None, None])
    return ans


# --------------------------------- main --------------------------------------

if __name__ == "__main__":
    N, C, target = 2, 4, 16
    sizes = [32, 16, 8, 4]  # one larger (adaptive pool), one equal, two smaller (bilinear)

    keys = jax.random.split(jax.random.PRNGKey(0), 13)
    xs = [jax.random.normal(keys[i], (N, C, s, s), jnp.float32)
          for i, s in enumerate(sizes)]
    anchor = jax.random.normal(keys[4], (N, C, target, target), jnp.float32)
    # Synthetic Conv2d(C, C, 3, padding=1) params, HWIO layout.
    weights = [0.1 * jax.random.normal(keys[5 + i], (3, 3, C, C), jnp.float32)
               for i in range(4)]
    biases = [0.1 * jax.random.normal(keys[9 + i], (C,), jnp.float32)
              for i in range(4)]

    out = jax.block_until_ready(sdi_forward(xs, anchor, weights, biases))
    ref = jax.block_until_ready(reference_forward(xs, anchor, weights, biases))

    assert out.shape == anchor.shape, (out.shape, anchor.shape)
    max_err = float(jnp.max(jnp.abs(out - ref)))
    if max_err > 2e-3:
        raise AssertionError(f"Pallas/reference mismatch, max abs err={max_err}")

    print("KERNEL_OK")
</pallas_src>

<mosaic_0001>
module attributes {stable_mosaic.version = 11 : i64} {
  func.func @kernel(%arg0: i32, %arg1: i32, %arg2: memref<1x16x128xbf16, #tpu.memory_space<vmem>>, %arg3: memref<1x1x16x16xbf16, #tpu.memory_space<vmem>>, %arg4: memref<1x1x16x16xbf16, #tpu.memory_space<vmem>>, %arg5: memref<9x16x16xbf16, #tpu.memory_space<vmem>>, %arg6: memref<16x1xf32, #tpu.memory_space<vmem>>, %arg7: memref<1x4x128xf32, #tpu.memory_space<vmem>>, %arg8: memref<16x160xbf16, #tpu.memory_space<vmem>>) attributes {dimension_semantics = [#tpu.dimension_semantics<parallel>, #tpu.dimension_semantics<parallel>], iteration_bounds = array<i64: 2, 2>, scalar_prefetch = 0 : i64, scratch_operands = 1 : i64, tpu.core_type = #tpu.core_type<tc>, window_params = [{transform_indices = @transform_0, window_bounds = array<i64: 1, 16, 128>}, {transform_indices = @transform_1, window_bounds = array<i64: 1, 1, 16, 16>}, {transform_indices = @transform_2, window_bounds = array<i64: 1, 1, 16, 16>}, {pipeline_mode = #tpu.pipeline_mode<synchronous>, transform_indices = @transform_3, window_bounds = array<i64: 9, 16, 16>}, {pipeline_mode = #tpu.pipeline_mode<synchronous>, transform_indices = @transform_4, window_bounds = array<i64: 16, 1>}, {transform_indices = @transform_5, window_bounds = array<i64: 1, 4, 128>}]} {
    %c0 = arith.constant 0 : index
    %c0_0 = arith.constant 0 : index
    %c0_1 = arith.constant 0 : index
    %c0_2 = arith.constant 0 : index
    %0 = vector.load %arg3[%c0, %c0_0, %c0_1, %c0_2] : memref<1x1x16x16xbf16, #tpu.memory_space<vmem>>, vector<1x1x16x16xbf16>
    %1 = vector.shape_cast %0 : vector<1x1x16x16xbf16> to vector<16x16xbf16>
    %c0_3 = arith.constant 0 : index
    %c0_4 = arith.constant 0 : index
    %2 = vector.load %arg8[%c0_3, %c0_4] : memref<16x160xbf16, #tpu.memory_space<vmem>>, vector<16x16xbf16>
    tpu.vector_store %arg8[%c0_3, %c0_4], %1 {strides = array<i32>} : memref<16x160xbf16, #tpu.memory_space<vmem>>, vector<16x16xbf16>,
    %c0_5 = arith.constant 0 : index
    %c0_6 = arith.constant 0 : index
    %c0_7 = arith.constant 0 : index
    %3 = vector.load %arg2[%c0_5, %c0_6, %c0_7] : memref<1x16x128xbf16, #tpu.memory_space<vmem>>, vector<1x16x128xbf16>
    %4 = vector.shape_cast %3 : vector<1x16x128xbf16> to vector<16x128xbf16>
    %c0_8 = arith.constant 0 : index
    %c16 = arith.constant 16 : index
    %5 = vector.load %arg8[%c0_8, %c16] : memref<16x160xbf16, #tpu.memory_space<vmem>>, vector<16x128xbf16>
    tpu.vector_store %arg8[%c0_8, %c16], %4 {strides = array<i32>} : memref<16x160xbf16, #tpu.memory_space<vmem>>, vector<16x128xbf16>,
    %c0_9 = arith.constant 0 : index
    %c0_10 = arith.constant 0 : index
    %c0_11 = arith.constant 0 : index
    %c0_12 = arith.constant 0 : index
    %6 = vector.load %arg4[%c0_9, %c0_10, %c0_11, %c0_12] : memref<1x1x16x16xbf16, #tpu.memory_space<vmem>>, vector<1x1x16x16xbf16>
    %7 = vector.shape_cast %6 : vector<1x1x16x16xbf16> to vector<16x16xbf16>
    %c0_13 = arith.constant 0 : index
    %c144 = arith.constant 144 : index
    %8 = vector.load %arg8[%c0_13, %c144] : memref<16x160xbf16, #tpu.memory_space<vmem>>, vector<16x16xbf16>
    tpu.vector_store %arg8[%c0_13, %c144], %7 {strides = array<i32>} : memref<16x160xbf16, #tpu.memory_space<vmem>>, vector<16x16xbf16>,
    %c0_14 = arith.constant 0 : index
    %c0_15 = arith.constant 0 : index
    %9 = vector.load %arg8[%c0_14, %c0_15] : memref<16x160xbf16, #tpu.memory_space<vmem>>, vector<16x160xbf16>
    %10 = tpu.iota {dimensions = array<i32: 1>} : vector<16x160xi32>
    %c16_i32 = arith.constant 16 : i32
    %c0_i32 = arith.constant 0 : i32
    %11 = arith.cmpi eq, %c16_i32, %c0_i32 : i32
    %c1_i32 = arith.constant 1 : i32
    %12 = arith.select %11, %c1_i32, %c16_i32 : i32
    %13 = vector.broadcast %12 : i32 to vector<16x160xi32>
    %14 = arith.remsi %10, %13 : vector<16x160xi32>
    %c0_i32_16 = arith.constant 0 : i32
    %15 = vector.broadcast %c0_i32_16 : i32 to vector<16x160xi32>
    %16 = arith.cmpi ne, %14, %15 : vector<16x160xi32>
    %c0_i32_17 = arith.constant 0 : i32
    %17 = vector.broadcast %c0_i32_17 : i32 to vector<16x160xi32>
    %18 = arith.cmpi slt, %14, %17 : vector<16x160xi32>
    %c0_i32_18 = arith.constant 0 : i32
    %19 = arith.cmpi slt, %12, %c0_i32_18 : i32
    %20 = vector.broadcast %19 : i1 to vector<16x160xi1>
    %21 = vector.broadcast %20 : vector<16x160xi1> to vector<16x160xi1>
    %22 = arith.xori %18, %21 : vector<16x160xi1>
    %23 = arith.andi %22, %16 : vector<16x160xi1>
    %24 = vector.broadcast %12 : i32 to vector<16x160xi32>
    %25 = arith.addi %14, %24 : vector<16x160xi32>
    %26 = arith.select %23, %25, %14 : vector<16x160xi1>, vector<16x160xi32>
    %cst = arith.constant 0.000000e+00 : bf16
    %27 = vector.broadcast %cst : bf16 to vector<16x160xbf16>
    %c0_i32_19 = arith.constant 0 : i32
    %28 = vector.broadcast %c0_i32_19 : i32 to vector<16x160xi32>
    %29 = arith.cmpi ne, %26, %28 : vector<16x160xi32>
    %30 = arith.select %29, %9, %27 : vector<16x160xi1>, vector<16x160xbf16>
    %c15_i32 = arith.constant 15 : i32
    %31 = vector.broadcast %c15_i32 : i32 to vector<16x160xi32>
    %32 = arith.cmpi ne, %26, %31 : vector<16x160xi32>
    %33 = arith.select %32, %9, %27 : vector<16x160xi1>, vector<16x160xbf16>
    %34 = vector.extract_strided_slice %30 {offsets = [0, 1], sizes = [16, 159], strides = [1, 1]} : vector<16x160xbf16> to vector<16x159xbf16>
    %35 = vector.extract_strided_slice %30 {offsets = [0, 0], sizes = [16, 1], strides = [1, 1]} : vector<16x160xbf16> to vector<16x1xbf16>
    %36 = tpu.concatenate %34, %35 in 1 : vector<16x159xbf16>, vector<16x1xbf16> -> vector<16x160xbf16>
    %37 = vector.extract_strided_slice %33 {offsets = [0, 159], sizes = [16, 1], strides = [1, 1]} : vector<16x160xbf16> to vector<16x1xbf16>
    %38 = vector.extract_strided_slice %33 {offsets = [0, 0], sizes = [16, 159], strides = [1, 1]} : vector<16x160xbf16> to vector<16x159xbf16>
    %39 = tpu.concatenate %37, %38 in 1 : vector<16x1xbf16>, vector<16x159xbf16> -> vector<16x160xbf16>
    %cst_20 = arith.constant 0.000000e+00 : f32
    %40 = vector.broadcast %cst_20 : f32 to vector<16x128xf32>
    %41 = vector.extract_strided_slice %39 {offsets = [0, 0], sizes = [16, 128], strides = [1, 1]} : vector<16x160xbf16> to vector<16x128xbf16>
    %c0_21 = arith.constant 0 : index
    %c0_22 = arith.constant 0 : index
    %c0_23 = arith.constant 0 : index
    %42 = vector.load %arg5[%c0_21, %c0_22, %c0_23] : memref<9x16x16xbf16, #tpu.memory_space<vmem>>, vector<1x16x16xbf16>
    %43 = vector.shape_cast %42 : vector<1x16x16xbf16> to vector<16x16xbf16>
    %cst_24 = arith.constant dense<0.000000e+00> : vector<16x128xf32>
    %44 = tpu.matmul %43, %41, %cst_24 {dimension_numbers = #tpu.dot_dimension_numbers<[1], [0], [0], [1], [0, 0, 1, 1], [], []>} : vector<16x16xbf16>, vector<16x128xbf16>, vector<16x128xf32> -> vector<16x128xf32>
    %45 = arith.addf %40, %44 : vector<16x128xf32>
    %46 = vector.extract_strided_slice %9 {offsets = [0, 0], sizes = [16, 128], strides = [1, 1]} : vector<16x160xbf16> to vector<16x128xbf16>
    %c1 = arith.constant 1 : index
    %c0_25 = arith.constant 0 : index
    %c0_26 = arith.constant 0 : index
    %47 = vector.load %arg5[%c1, %c0_25, %c0_26] : memref<9x16x16xbf16, #tpu.memory_space<vmem>>, vector<1x16x16xbf16>
    %48 = vector.shape_cast %47 : vector<1x16x16xbf16> to vector<16x16xbf16>
    %cst_27 = arith.constant dense<0.000000e+00> : vector<16x128xf32>
    %49 = tpu.matmul %48, %46, %cst_27 {dimension_numbers = #tpu.dot_dimension_numbers<[1], [0], [0], [1], [0, 0, 1, 1], [], []>} : vector<16x16xbf16>, vector<16x128xbf16>, vector<16x128xf32> -> vector<16x128xf32>
    %50 = arith.addf %45, %49 : vector<16x128xf32>
    %51 = vector.extract_strided_slice %36 {offsets = [0, 0], sizes = [16, 128], strides = [1, 1]} : vector<16x160xbf16> to vector<16x128xbf16>
    %c2 = arith.constant 2 : index
    %c0_28 = arith.constant 0 : index
    %c0_29 = arith.constant 0 : index
    %52 = vector.load %arg5[%c2, %c0_28, %c0_29] : memref<9x16x16xbf16, #tpu.memory_space<vmem>>, vector<1x16x16xbf16>
    %53 = vector.shape_cast %52 : vector<1x16x16xbf16> to vector<16x16xbf16>
    %cst_30 = arith.constant dense<0.000000e+00> : vector<16x128xf32>
    %54 = tpu.matmul %53, %51, %cst_30 {dimension_numbers = #tpu.dot_dimension_numbers<[1], [0], [0], [1], [0, 0, 1, 1], [], []>} : vector<16x16xbf16>, vector<16x128xbf16>, vector<16x128xf32> -> vector<16x128xf32>
    %55 = arith.addf %50, %54 : vector<16x128xf32>
    %56 = vector.extract_strided_slice %39 {offsets = [0, 16], sizes = [16, 128], strides = [1, 1]} : vector<16x160xbf16> to vector<16x128xbf16>
    %c3 = arith.constant 3 : index
    %c0_31 = arith.constant 0 : index
    %c0_32 = arith.constant 0 : index
    %57 = vector.load %arg5[%c3, %c0_31, %c0_32] : memref<9x16x16xbf16, #tpu.memory_space<vmem>>, vector<1x16x16xbf16>
    %58 = vector.shape_cast %57 : vector<1x16x16xbf16> to vector<16x16xbf16>
    %cst_33 = arith.constant dense<0.000000e+00> : vector<16x128xf32>
    %59 = tpu.matmul %58, %56, %cst_33 {dimension_numbers = #tpu.dot_dimension_numbers<[1], [0], [0], [1], [0, 0, 1, 1], [], []>} : vector<16x16xbf16>, vector<16x128xbf16>, vector<16x128xf32> -> vector<16x128xf32>
    %60 = arith.addf %55, %59 : vector<16x128xf32>
    %61 = vector.extract_strided_slice %9 {offsets = [0, 16], sizes = [16, 128], strides = [1, 1]} : vector<16x160xbf16> to vector<16x128xbf16>
    %c4 = arith.constant 4 : index
    %c0_34 = arith.constant 0 : index
    %c0_35 = arith.constant 0 : index
    %62 = vector.load %arg5[%c4, %c0_34, %c0_35] : memref<9x16x16xbf16, #tpu.memory_space<vmem>>, vector<1x16x16xbf16>
    %63 = vector.shape_cast %62 : vector<1x16x16xbf16> to vector<16x16xbf16>
    %cst_36 = arith.constant dense<0.000000e+00> : vector<16x128xf32>
    %64 = tpu.matmul %63, %61, %cst_36 {dimension_numbers = #tpu.dot_dimension_numbers<[1], [0], [0], [1], [0, 0, 1, 1], [], []>} : vector<16x16xbf16>, vector<16x128xbf16>, vector<16x128xf32> -> vector<16x128xf32>
    %65 = arith.addf %60, %64 : vector<16x128xf32>
    %66 = vector.extract_strided_slice %36 {offsets = [0, 16], sizes = [16, 128], strides = [1, 1]} : vector<16x160xbf16> to vector<16x128xbf16>
    %c5 = arith.constant 5 : index
    %c0_37 = arith.constant 0 : index
    %c0_38 = arith.constant 0 : index
    %67 = vector.load %arg5[%c5, %c0_37, %c0_38] : memref<9x16x16xbf16, #tpu.memory_space<vmem>>, vector<1x16x16xbf16>
    %68 = vector.shape_cast %67 : vector<1x16x16xbf16> to vector<16x16xbf16>
    %cst_39 = arith.constant dense<0.000000e+00> : vector<16x128xf32>
    %69 = tpu.matmul %68, %66, %cst_39 {dimension_numbers = #tpu.dot_dimension_numbers<[1], [0], [0], [1], [0, 0, 1, 1], [], []>} : vector<16x16xbf16>, vector<16x128xbf16>, vector<16x128xf32> -> vector<16x128xf32>
    %70 = arith.addf %65, %69 : vector<16x128xf32>
    %71 = vector.extract_strided_slice %39 {offsets = [0, 32], sizes = [16, 128], strides = [1, 1]} : vector<16x160xbf16> to vector<16x128xbf16>
    %c6 = arith.constant 6 : index
    %c0_40 = arith.constant 0 : index
    %c0_41 = arith.constant 0 : index
    %72 = vector.load %arg5[%c6, %c0_40, %c0_41] : memref<9x16x16xbf16, #tpu.memory_space<vmem>>, vector<1x16x16xbf16>
    %73 = vector.shape_cast %72 : vector<1x16x16xbf16> to vector<16x16xbf16>
    %cst_42 = arith.constant dense<0.000000e+00> : vector<16x128xf32>
    %74 = tpu.matmul %73, %71, %cst_42 {dimension_numbers = #tpu.dot_dimension_numbers<[1], [0], [0], [1], [0, 0, 1, 1], [], []>} : vector<16x16xbf16>, vector<16x128xbf16>, vector<16x128xf32> -> vector<16x128xf32>
    %75 = arith.addf %70, %74 : vector<16x128xf32>
    %76 = vector.extract_strided_slice %9 {offsets = [0, 32], sizes = [16, 128], strides = [1, 1]} : vector<16x160xbf16> to vector<16x128xbf16>
    %c7 = arith.constant 7 : index
    %c0_43 = arith.constant 0 : index
    %c0_44 = arith.constant 0 : index
    %77 = vector.load %arg5[%c7, %c0_43, %c0_44] : memref<9x16x16xbf16, #tpu.memory_space<vmem>>, vector<1x16x16xbf16>
    %78 = vector.shape_cast %77 : vector<1x16x16xbf16> to vector<16x16xbf16>
    %cst_45 = arith.constant dense<0.000000e+00> : vector<16x128xf32>
    %79 = tpu.matmul %78, %76, %cst_45 {dimension_numbers = #tpu.dot_dimension_numbers<[1], [0], [0], [1], [0, 0, 1, 1], [], []>} : vector<16x16xbf16>, vector<16x128xbf16>, vector<16x128xf32> -> vector<16x128xf32>
    %80 = arith.addf %75, %79 : vector<16x128xf32>
    %81 = vector.extract_strided_slice %36 {offsets = [0, 32], sizes = [16, 128], strides = [1, 1]} : vector<16x160xbf16> to vector<16x128xbf16>
    %c8 = arith.constant 8 : index
    %c0_46 = arith.constant 0 : index
    %c0_47 = arith.constant 0 : index
    %82 = vector.load %arg5[%c8, %c0_46, %c0_47] : memref<9x16x16xbf16, #tpu.memory_space<vmem>>, vector<1x16x16xbf16>
    %83 = vector.shape_cast %82 : vector<1x16x16xbf16> to vector<16x16xbf16>
    %cst_48 = arith.constant dense<0.000000e+00> : vector<16x128xf32>
    %84 = tpu.matmul %83, %81, %cst_48 {dimension_numbers = #tpu.dot_dimension_numbers<[1], [0], [0], [1], [0, 0, 1, 1], [], []>} : vector<16x16xbf16>, vector<16x128xbf16>, vector<16x128xf32> -> vector<16x128xf32>
    %85 = arith.addf %80, %84 : vector<16x128xf32>
    %c0_49 = arith.constant 0 : index
    %c0_50 = arith.constant 0 : index
    %86 = vector.load %arg6[%c0_49, %c0_50] : memref<16x1xf32, #tpu.memory_space<vmem>>, vector<16x1xf32>
    %87 = vector.broadcast %86 : vector<16x1xf32> to vector<16x128xf32>
    %88 = arith.addf %85, %87 : vector<16x128xf32>
    %89 = vector.extract_strided_slice %88 {offsets = [0, 0], sizes = [4, 128], strides = [1, 1]} : vector<16x128xf32> to vector<4x128xf32>
    %90 = vector.extract_strided_slice %88 {offsets = [4, 0], sizes = [4, 128], strides = [1, 1]} : vector<16x128xf32> to vector<4x128xf32>
    %91 = arith.mulf %89, %90 : vector<4x128xf32>
    %92 = vector.extract_strided_slice %88 {offsets = [8, 0], sizes = [4, 128], strides = [1, 1]} : vector<16x128xf32> to vector<4x128xf32>
    %93 = arith.mulf %91, %92 : vector<4x128xf32>
    %94 = vector.extract_strided_slice %88 {offsets = [12, 0], sizes = [4, 128], strides = [1, 1]} : vector<16x128xf32> to vector<4x128xf32>
    %95 = arith.mulf %93, %94 : vector<4x128xf32>
    %c0_51 = arith.constant 0 : index
    %c0_52 = arith.constant 0 : index
    %c0_53 = arith.constant 0 : index
    %96 = vector.load %arg7[%c0_51, %c0_52, %c0_53] : memref<1x4x128xf32, #tpu.memory_space<vmem>>, vector<1x4x128xf32>
    %97 = vector.shape_cast %96 : vector<1x4x128xf32> to vector<4x128xf32>
    %98 = vector.shape_cast %95 : vector<4x128xf32> to vector<1x4x128xf32>
    tpu.vector_store %arg7[%c0_51, %c0_52, %c0_53], %98 {strides = array<i32>} : memref<1x4x128xf32, #tpu.memory_space<vmem>>, vector<1x4x128xf32>,
    return
  }
  func.func @transform_0(%arg0: i32, %arg1: i32) -> (i32, i32, i32) {
    %c0_i32 = arith.constant 0 : i32
    %c0_i32_0 = arith.constant 0 : i32
    return %arg0, %c0_i32, %arg1 : i32, i32, i32
  }
  func.func @transform_1(%arg0: i32, %arg1: i32) -> (i32, i32, i32, i32) {
    %c0_i32 = arith.constant 0 : i32
    %c0_i32_0 = arith.constant 0 : i32
    %c0_i32_1 = arith.constant 0 : i32
    return %arg0, %arg1, %c0_i32, %c0_i32_0 : i32, i32, i32, i32
  }
  func.func @transform_2(%arg0: i32, %arg1: i32) -> (i32, i32, i32, i32) {
    %c0_i32 = arith.constant 0 : i32
    %c0_i32_0 = arith.constant 0 : i32
    %c0_i32_1 = arith.constant 0 : i32
    return %arg0, %arg1, %c0_i32, %c0_i32_0 : i32, i32, i32, i32
  }
  func.func @transform_3(%arg0: i32, %arg1: i32) -> (i32, i32, i32) {
    %c0_i32 = arith.constant 0 : i32
    %c0_i32_0 = arith.constant 0 : i32
    %c0_i32_1 = arith.constant 0 : i32
    %c0_i32_2 = arith.constant 0 : i32
    return %c0_i32, %c0_i32_0, %c0_i32_1 : i32, i32, i32
  }
  func.func @transform_4(%arg0: i32, %arg1: i32) -> (i32, i32) {
    %c0_i32 = arith.constant 0 : i32
    %c0_i32_0 = arith.constant 0 : i32
    %c0_i32_1 = arith.constant 0 : i32
    return %c0_i32, %c0_i32_0 : i32, i32
  }
  func.func @transform_5(%arg0: i32, %arg1: i32) -> (i32, i32, i32) {
    %c0_i32 = arith.constant 0 : i32
    %c0_i32_0 = arith.constant 0 : i32
    return %arg0, %c0_i32, %arg1 : i32, i32, i32
  }
}

</mosaic_0001>

<bundles_post_ra>
// kernel: tpu_custom_call.1
= control target key start
LH: loop header
LB: loop body
LE: loop exit
PB: predicated region body
PF: predicated region fallthrough
CT: control target
= control target key end

     0   :  { %s2021_s0 = inlined_call_operand.hbm [shape: bf16[2,16,256], index: 0, kind: input, shape index: {}]   ;;  %s2022_s1 = inlined_call_operand.hbm [shape: bf16[2,2,16,16], index: 1, kind: input, shape index: {}]   ;;  %s2023_s2 = inlined_call_operand.hbm [shape: bf16[2,2,16,16], index: 2, kind: input, shape index: {}]   ;;  %s2024_s3 = inlined_call_operand.hbm [shape: bf16[9,16,16], index: 3, kind: input, shape index: {}]   ;;  %s2025_s4 = inlined_call_operand.vmem [shape: f32[16,1], index: 4, kind: input, shape index: {}]   ;;  %s2026_s5 = inlined_call_operand.hbm [shape: f32[2,4,256], index: 5, kind: output, shape index: {}]  }
   0x1   :  { %2039 = sst [smem:[#allocation20_spill]] %s2021_s0 }
   0x2   :  { %2040 = sst [smem:[#allocation21_spill]] %s2022_s1 }
   0x3   :  { %2041 = sst [smem:[#allocation22_spill]] %s2023_s2 }
   0x4   :  { %2042 = sst [smem:[#allocation23_spill]] %s2026_s5 }
   0x5   :  { %10 = vsyncpa [#allocation4], 0 }
   0x6   :  { %12 = vsyncpa [#allocation4 + $0x1], 0 }
   0x7   :  { %13 = vsyncpa [#allocation7], 0 }
   0x8   :  { %15 = vsyncpa [#allocation7 + $0x1], 0 }
   0x9   :  { %16 = vsyncpa [#allocation10], 0 }
   0xa   :  { %17 = vsyncpa [#allocation5], 0 }
   0xb   :  { %19 = vsyncpa [#allocation5 + $0x1], 0  ;;  %s1707_s18 = smov 0   ;;  %s1709_s19 = smov 0  }
   0xc   :  { %s1711_s20 = smov 0   ;;  %s1713_s21 = smov 0  }
   0xd   :  { %s1715_s22 = smov 0   ;;  %s1717_s23 = smov 0  }
   0xe   :  { %s1719_s24 = smov 0   ;;  %s1721_s25 = smov 0  }
   0xf LB: > { %2043 = sst [smem:[#allocation16_spill]] %s1649_s23  ;;  %s34_s26 = sadd.s32 1, %s1649_s23  ;;  %s1657_s25 = sphi %s1721_s25, %s25_s25   ;;  %s1653_s24 = sphi %s1719_s24, %s2071_s24   ;;  %s1649_s23 = sphi %s1717_s23, %s2070_s23   ;;  %s1645_s22 = sphi %s1715_s22, %s2069_s22   ;;  %s1641_s21 = sphi %s1713_s21, %s2068_s21   ;;  %s1637_s20 = sphi %s1711_s20, %s2074_s20   ;;  %s1633_s19 = sphi %s1709_s19, %s2073_s19   ;;  %s1629_s18 = sphi %s1707_s18, %s2072_s18  }
  0x10   : > { %2044 = sst [smem:[#allocation17_spill]] %s1653_s24  ;;  %s37_s27 = sadd.s32 1, %s1653_s24 }
  0x11   : > { %p35_p0 = scmp.ge.s32.totalorder %s34_s26, 2  ;;  %s46_s28 = sadd.s32 1, %s1637_s20 }
  0x12   : > { %p53_p1 = scmp.ne.s32.totalorder %s1637_s20, %s1633_s19  ;;  %p54_p2 = scmp.eq.s32.totalorder %s1657_s25, 0 }
  0x13   : > { %s2076_s26 = smov (%p35_p0, %s34_s26), 0  ;;  %s2078_s27 = smov (!%p35_p0, %s37_s27), %s1653_s24 }
  0x14   : > { %2045 = sst [smem:[#allocation18_spill]] %s2076_s26  ;;  %s42_s29 = ssub.s32 %s1649_s23, %s2076_s26 }
  0x15   : > { %p55_p3 = por %p54_p2, %p53_p1  ;;  %p39_p4 = scmp.ge.s32.totalorder %s2078_s27, 2 }
  0x16   : > { %p1349_p5 = scmp.lt.s32.totalorder %s1657_s25, 4  ;;  %s2027_s30 = sand.u32 1, %s1637_s20  }
  0x17   : > { %s2080_s27 = smov (%p39_p4, %s2078_s27), 0  ;;  %s1769_s7 = sshll.u32 %s2027_s30, 3 }
  0x18   : > { %2046 = sst [smem:[#allocation19_spill]] %s2080_s27  ;;  %s41_s6 = ssub.s32 %s1653_s24, %s2080_s27 }
  0x19   : > { %s43_s8 = sor.u32 %s42_s29, %s41_s6  ;;  %s1201_s9 = sshll.u32 %s1653_s24, 2 }
  0x1a   : > { %p44_p6 = scmp.eq.s32.totalorder %s43_s8, 0  ;;  %s1773_s10 = sadd.s32 %s1649_s23, %s1201_s9 }
  0x1b   : > { %p1775_p7 = pnand %p1349_p5, %p55_p3  ;;  %s247_s12 = sand.u32 1, %s1657_s25  }
  0x1c   : > { %s1781_s13 = scalar_select %p44_p6, %s1637_s20, %s46_s28  }
  0x1d   : > { %s1204_s14 = sshll.u32 %s1649_s23, 1  ;;  %s251_s16 = scalar_lea.vmem [#allocation6], %s1769_s7 }
  0x1e   : > { %s257_s15 = sadd.s32 %s1204_s14, %s1201_s9  ;;  %s260_s17 = sshll.u32 %s251_s16, 4  ;;  %s261_s17 = int_to_ptr.vmem [resolvable:$true] %s260_s17 }
  0x1f   : > { %s1206_s30 = sshll.u32 %s257_s15, 6  ;;  %s2048_s1 = sld [smem:[#allocation21_spill]] }
  0x20   : > { %s2049_s2 = sld [smem:[#allocation22_spill]]  ;;  %s1793_s5 = scalar_lea.sflag [#allocation7], %s247_s12 }
  0x21   : > { %p2036_p8 = pneg %p1775_p7  ;;  %s1456_s28 = scalar_lea.vmem %s261_s17, 128 }
  0x22   : > { %p1457_p9 = scmp.ne.s32.totalorder %s261_s17, %s1456_s28  ;;  %s1659_s9 = smov [#allocation6]  }
  0x23   : > { %s1461_s14 = sshll.u32 %s1659_s9, 4  ;;  %s1462_s14 = int_to_ptr.vmem [resolvable:$false] %s1461_s14 }
  0x24   : > { %p1459_p10 = pnand %p1457_p9, %p2036_p8  ;;  %s1463_s15 = scalar_lea.vmem %s1462_s14, 256 }
  0x25   : > { %s259_s8 = scalar_lea.hbm %s2048_s1, %s1206_s30  ;;  %p1464_p12 = scmp.lt.s32.totalorder %s261_s17, %s1462_s14 }
  0x26   : > { %s1791_s24 = scalar_lea.hbm %s2049_s2, %s1206_s30  ;;  %p1460_p11 = pneg %p1459_p10 }
  0x27   : > { %p1465_p13 = scmp.lt.s32.totalorder %s1463_s15, %s1456_s28 }
  0x29   : > { %p1466_p0 = por %p1465_p13, %p1464_p12 }
  0x2b   : > { %p1467_p2 = pnand %p1466_p0, %p1460_p11 }
  0x2d   : > { %1470 = shalt.err (!%p1467_p2)
}
  0x2e   : > { %s2032_s26 = smov 64   ;;  %s2034_s27 = smov 4  }
  0x2f   : > { %1340 = dma.hbm_to_vmem [thread:$0]  (!%p1775_p7), %s259_s8, 128, %s261_s17, %s1793_s5, %s2032_s26, %s2032_s26, %s2034_s27  }
  0x30   : > { %s1807_s30 = sadd.s32 4294967295, %s1657_s25   ;;  %s1196_s12 = sadd.s32 4294967294, %s1657_s25  }
  0x31   : > { %p59_p3 = scmp.ne.s32.totalorder %s1633_s19, %s1629_s18  ;;  %p60_p4 = scmp.eq.s32.totalorder %s1807_s30, 0 }
  0x32   : > { %p183_p5 = scmp.eq.s32.totalorder %s1807_s30, 3  ;;  %p189_p6 = scmp.eq.s32.totalorder %s1196_s12, 3 }
  0x33   : > { %p1816_p9 = por %p60_p4, %p59_p3  ;;  %p1197_p10 = scmp.ge.s32.totalorder %s1657_s25, 1 }
  0x34   : > { %p1824_p11 = por %p183_p5, %p53_p1  ;;  %p1828_p12 = por %p189_p6, %p59_p3 }
  0x35   : > { %p196_p13 = scmp.lt.s32.totalorder %s1657_s25, 5  ;;  %s1662_s8 = smov [#allocation9]  }
  0x36   : > { %s2051_s17 = scalar_select %p1824_p11, 1, 0 }
  0x37   : > { %s2052_s29 = scalar_select %p1828_p12, 1, 0 }
  0x38   : > { %p1833_p0 = pnand %p1197_p10, %p196_p13  ;;  %s208_s28 = sshll.u32 %s1662_s8, 4  ;;  %s209_s28 = int_to_ptr.vmem [resolvable:$true] %s208_s28 }
  0x39   : > { %s1202_s9 = sshll.u32 %s1773_s10, 6  ;;  %s2054_s0 = sld [smem:[#allocation20_spill]] }
  0x3a   : > { %p1330_p2 = pneg %p1833_p0  ;;  %s229_s26 = scalar_lea.vmem [#allocation3], %s1769_s7 }
  0x3b   : > { %s237_s27 = sshll.u32 %s229_s26, 4  ;;  %s274_s8 = scalar_lea.vmem [#allocation8], %s1769_s7  ;;  %s1852_s27 = int_to_ptr.vmem [resolvable:$true] %s237_s27 }
  0x3c   : > { %p1848_p1 = pnand %p1330_p2, %p60_p4  ;;  %s1855_s2 = sshll.u32 %s274_s8, 4  ;;  %s284_s2 = int_to_ptr.vmem [resolvable:$true] %s1855_s2 }
  0x3d   : > { %s1482_s10 = scalar_lea.vmem %s209_s28, 1152  ;;  %p1490_p13 = scmp.lt.s32.totalorder %s209_s28, %s209_s28 }
  0x3e   : > { %p1473_p3 = pneg %p1848_p1  ;;  %p1483_p5 = scmp.ne.s32.totalorder %s209_s28, %s1482_s10 }
  0x3f   : > { %s1843_s12 = scalar_lea.hbm %s2054_s0, %s1202_s9  ;;  %p1491_p8 = scmp.lt.s32.totalorder %s1482_s10, %s1482_s10 }
  0x40   : > { %p1485_p6 = pnand %p1483_p5, %p1473_p3 }
  0x41   : > { %p1492_p12 = por %p1491_p8, %p1490_p13 }
  0x42   : > { %p1486_p10 = pneg %p1485_p6 }
  0x44   : > { %p1493_p11 = pnand %p1492_p12, %p1486_p10 }
  0x46   : > { %1496 = shalt.err (!%p1493_p11)
}
  0x47   : > { %s2056_s26 = smov 4   ;;  %s2057_s9 = smov 64  }
  0x48   : > { %1333 = dma.hbm_to_vmem [thread:$0]  (!%p1848_p1), %s2024_s3, 1152, %s209_s28, [#allocation10], %s2057_s9, %s2057_s9, %s2056_s26  }
  0x49   : > { %s2058_s15 = sand.u32 1, %s1637_s20   ;;  %s1510_s10 = scalar_lea.vmem %s1852_s27, 128 }
  0x4a   : > { %s226_s8 = scalar_lea.sflag [#allocation4], %s2058_s15  ;;  %p1511_p8 = scmp.ne.s32.totalorder %s1852_s27, %s1510_s10 }
  0x4b   : > { %p2059_p11 = pneg %p1775_p7  ;;  %s1663_s1 = smov [#allocation3]  }
  0x4c   : > { %s1515_s0 = sshll.u32 %s1663_s1, 4  ;;  %s1516_s0 = int_to_ptr.vmem [resolvable:$false] %s1515_s0 }
  0x4d   : > { %p1513_p12 = pnand %p1511_p8, %p2059_p11  ;;  %s1517_s23 = scalar_lea.vmem %s1516_s0, 256 }
  0x4e   : > { %p1518_p3 = scmp.lt.s32.totalorder %s1852_s27, %s1516_s0  ;;  %p1519_p5 = scmp.lt.s32.totalorder %s1517_s23, %s1510_s10 }
  0x4f   : > { %p1514_p2 = pneg %p1513_p12 }
  0x50   : > { %p1520_p6 = por %p1519_p5, %p1518_p3 }
  0x52   : > { %p1521_p10 = pnand %p1520_p6, %p1514_p2 }
  0x54   : > { %1524 = shalt.err (!%p1521_p10)
}
  0x55   : > { %s1664_s14 = smov 128   ;;  %s1538_s28 = scalar_lea.vmem %s284_s2, 128 }
  0x56   : > { %1337 = dma.hbm_to_vmem [thread:$0]  (!%p1775_p7), %s1843_s12, 128, %s1852_s27, %s226_s8, %s1664_s14, %s2057_s9, %s2056_s26  }
  0x57   : > { %p1539_p1 = scmp.ne.s32.totalorder %s284_s2, %s1538_s28  ;;  %p2060_p13 = pmov %p2059_p11 }
  0x58   : > { %s1665_s0 = smov [#allocation8]  }
  0x59   : > { %p1541_p8 = pnand %p1539_p1, %p2060_p13  ;;  %s1543_s23 = sshll.u32 %s1665_s0, 4  ;;  %s1544_s23 = int_to_ptr.vmem [resolvable:$false] %s1543_s23 }
  0x5a   : > { %s1545_s7 = scalar_lea.vmem %s1544_s23, 256  ;;  %p1546_p12 = scmp.lt.s32.totalorder %s284_s2, %s1544_s23 }
  0x5b   : > { %p1542_p11 = pneg %p1541_p8  ;;  %p1547_p2 = scmp.lt.s32.totalorder %s1545_s7, %s1538_s28 }
  0x5d   : > { %p1548_p3 = por %p1547_p2, %p1546_p12 }
  0x5f   : > { %p1549_p5 = pnand %p1548_p3, %p1542_p11 }
  0x61   : > { %1552 = shalt.err (!%p1549_p5)
}
  0x62   : > { %1343 = dma.hbm_to_vmem [thread:$0]  (!%p1775_p7), %s1791_s24, 128, %s284_s2, %s1793_s5, %s2057_s9, %s2057_s9, %s2056_s26  }
  0x63   : > { %295 = sbr.rel (%p1833_p0) target bundleno = 723 (0x2d3), region = 40  ;;  %s1895_s27 = sand.u32 (!%p1833_p0), 1, %s1633_s19  }
  0x64   : > { %s1212_s12 = sshll.u32 (!%p1833_p0), %s1895_s27, 3  ;;  %s298_s15 = scalar_lea.sflag (!%p1833_p0), [#allocation4], %s1895_s27 }
  0x65   : > { %s301_s8 = scalar_lea.vmem (!%p1833_p0), [#allocation3], %s1212_s12 }
  0x68   : > { %1612 = dma.done.wait (%p1816_p9), %s298_s15, 128  }
  0x69   : > { %1614 = vsyncadd (%p1816_p9), %s298_s15, 4294967168  ;;  %s306_s2 = sand.u32 1, %s1807_s30   ;;  %s310_s24 = scalar_lea.vmem [#allocation6], %s1212_s12 }
  0x6a   : > { %s307_s5 = scalar_lea.sflag [#allocation7], %s306_s2 }
  0x6b   : > { %1616 = dma.done.wait (%p1816_p9), %s307_s5, 256  }
  0x6c   : > { %1618 = vsyncadd (%p1816_p9), %s307_s5, 4294967040  ;;  %s319_s11 = scalar_lea.vmem [#allocation8], %s1212_s12 }
  0x6d   : > { %1620 = dma.done.wait (%p60_p4), [#allocation10], 1152  }
  0x6e   : > { %1622 = vsyncadd (%p60_p4), [#allocation10], 4294966144  ;;  %v1666_v0 = vmov 0.0   ;;  %vm363_vm0 = vcmask 125952   ;;  %v366_v1 = vld [vmem:[%s301_s8] sm:$0xf]  ;;  %v401_v7 = vlaneseq }
  0x6f   : > { %1264 = vmatprep.subr.bf16.mxu0 %v1666_v0  ;;  %1270 = vmatprep.subr.bf16.mxu1 %v1666_v0  ;;  %v386_v2 = vld [vmem:[%s319_s11] sm:$0xf]  ;;  %s1667_s6 = smov 16   ;;  %v367_v3 = vld [vmem:[%s301_s8 + $0x4] sm:$0xf]  ;;  %vm381_vm1 = vcmask 1043584  }
  0x70   : > { %370 = vrot.lane.b32.xlu0 %v366_v1, %s1667_s6  ;;  %390 = vrot.lane.b32.xlu1 %v386_v2, %s1667_s6  ;;  %v361_v4 = vld [vmem:[%s310_s24] sm:$0xf]  ;;  %v387_v5 = vld [vmem:[%s319_s11 + $0x4] sm:$0xf]  ;;  %vm382_vm2 = vcmask 130052   ;;  %v402_v8 = vand.u32 127, %v401_v7 }
  0x71   : > { %364 = vst.msk [vmem:[#allocation2] sm:$0xf] %vm363_vm0, %v361_v4  ;;  %v362_v6 = vld [vmem:[%s310_s24 + $0x4] sm:$0xf]  ;;  %vm376_vm3 = vcmask 130048   ;;  %vm383_vm4 = vmor %vm382_vm2, %vm381_vm1  ;;  %vm396_vm5 = vcmask 257152  }
  0x72   : > { %365 = vst.msk [vmem:[#allocation2 + $0x8] sm:$0xf] %vm363_vm0, %v362_v6  ;;  %v403_v13 = vadd.s32 128, %v402_v8  ;;  %v408_v18 = vand.u32 15, %v402_v8  ;;  %vm1668_vm11 = vmmov 0   ;;  %v1433_v30 = vld [vmem:[#allocation9 + $0x8] sm:$0xff]  }
  0x73   : > { %1266 = vmatprep.mubr.msk.bf16.mxu0 %vm1668_vm11, %v1666_v0  ;;  %1272 = vmatprep.mubr.msk.bf16.mxu1 %vm1668_vm11, %v1666_v0  ;;  %s1669_s30 = smov 1   ;;  %s1670_s16 = smov 97   ;;  %vm473_vm13 = vcmask 7168   ;;  %v1435_v38 = vld [vmem:[#allocation9] sm:$0xff]   ;;  %vm450_vm14 = vcmask 1039360   ;;  %vm455_vm15 = vcmask 252928  }
  0x74   : > { %372 = vrot.lane.b32.xlu0 %v367_v3, %s1667_s6  ;;  %392 = vrot.lane.b32.xlu1 %v387_v5, %s1667_s6  ;;  %v415_v19 = vand.u32 15, %v403_v13  ;;  %vm433_vm6 = vcmp.ne.s32.totalorder %v408_v18, 15  ;;  %vm1916_vm9 = vcmp.ne.s32.totalorder %v408_v18, 0  ;;  %s1671_s26 = smov 127   ;;  %s1672_s9 = smov 31   ;;  %v1436_v45 = vld [vmem:[#allocation9 + $0x10] sm:$0xff]  }
  0x75   : > { %s1673_s10 = smov 112   ;;  %s1674_s1 = smov 96   ;;  %v1675_v47 = vmov 0   ;;  %v1011_v48 = vld [vmem:[%s2025_s4] sm:$0xff]  ;;  %v1012_v49 = vld [vmem:[%s2025_s4 + $0x8] sm:$0xff]  ;;  %vm657_vm0 = vcmask 916480  }
  0x76   : > { %vm434_vm7 = vcmp.ne.s32.totalorder %v415_v19, 15  ;;  %vm1920_vm10 = vcmp.ne.s32.totalorder %v415_v19, 0  ;;  %1430 = vset.pattern.permute.xlu0 %v1675_v47  ;;  %1431 = vset.pattern.permute.xlu1 %v1675_v47  ;;  %v1437_v58 = vld [vmem:[#allocation9 + $0x18] sm:$0xff]   ;;  %v1438_v62 = vld [vmem:[#allocation9 + $0x20] sm:$0xff]   ;;  %v1439_v3 = vld [vmem:[#allocation9 + $0x28] sm:$0xff]   ;;  %vm842_vm1 = vcmask 785408  }
  0x77   : > { %vm435_vm8 = vmpackc.low %vm434_vm7, %vm433_vm6  ;;  %v1440_v6 = vld [vmem:[#allocation9 + $0x30] sm:$0xff]   ;;  %s1216_s7 = sshll.u32 %s1895_s27, 2  ;;  %s1242_s12 = sshll.u32 %s1645_s22, 1 }
  0x78   : > { %vm430_vm12 = vmpackc.low %vm1920_vm10, %vm1916_vm9  ;;  %s1047_s15 = sadd.s32 %s1641_s21, %s1242_s12  ;;  %s359_s2 = scalar_lea.vmem [#allocation11], %s1216_s7 }
  0x79   : > { %s1243_s8 = sshll.u32 %s1047_s15, 6  ;;  %s1051_s5 = sshll.u32 %s359_s2, 4  ;;  %s1052_s5 = int_to_ptr.vmem [resolvable:$true] %s1051_s5 }
  0x7a   : > { %s2065_s11 = sld [smem:[#allocation23_spill]]  ;;  %p2066_p4 = scmp.ne.s32.totalorder %s2051_s17, 0 }
  0x7b   : > { %s1676_s21 = smov [#allocation11]  }
  0x80   : > { %s1049_s6 = scalar_lea.hbm %s2065_s11, %s1243_s8 }
  0xe2   : > { %v371_v9 = vpop.permute.xlu0 %370  ;;  %v391_v10 = vpop.permute.xlu1 %390 }
  0xe3   : > { %v374_v11 = vrot.slane %v371_v9, 4 }
  0xe5   : > { %v377_v12 = vsel %vm376_vm3, %v374_v11, %v371_v9 }
  0xe6   : > { %384 = vst.msk [vmem:[#allocation2] sm:$0xff] %vm383_vm4, %v377_v12  ;;  %v373_v14 = vpop.permute.xlu0 %372  ;;  %v393_v16 = vpop.permute.xlu1 %392 }
  0xe7   : > { %397 = vst.msk [vmem:[#allocation2 + $0x4] sm:$0xf] %vm396_vm5, %v391_v10  ;;  %v375_v15 = vrot.slane %v373_v14, 4  ;;  %v1441_v10 = vld [vmem:[#allocation9 + $0x38] sm:$0xff]  }
  0xe9   : > { %v378_v17 = vsel %vm376_vm3, %v375_v15, %v373_v14  ;;  %v1442_v14 = vld [vmem:[#allocation9 + $0x40] sm:$0xff]  }
  0xea   : > { %385 = vst.msk [vmem:[#allocation2 + $0x8] sm:$0xff] %vm383_vm4, %v378_v17 }
  0xeb   : > { %398 = vst.msk [vmem:[#allocation2 + $0xc] sm:$0xf] %vm396_vm5, %v393_v16 }
  0xee   : > { %v399_v20 = vld [vmem:[#allocation2] sm:$0xff] }
  0xef   : > { %v436_v25 = vsel %vm435_vm8, %v399_v20, 0  ;;  %v431_v32 = vsel %vm430_vm12, %v399_v20, 0 }
  0xf2   : > { %v400_v23 = vld [vmem:[#allocation2 + $0x8] sm:$0xff] }
  0xf3   : > { %v1222_v24 = vcombine.low %v399_v20, %v400_v23  ;;  %v437_v26 = vsel %vm435_vm8, %v400_v23, 0  ;;  %v1231_v27 = vcombine.high %v399_v20, %v400_v23  ;;  %v432_v31 = vsel %vm430_vm12, %v400_v23, 0 }
  0xf4   : > { %v1220_v28 = vcombine.low %v436_v25, %v437_v26  ;;  %v1219_v29 = vcombine.high %v436_v25, %v437_v26  ;;  %v1217_v33 = vcombine.low %v431_v32, %v432_v31  ;;  %v1218_v34 = vcombine.high %v431_v32, %v432_v31 }
  0xf5   : > { %1265 = vmatpush3.bf16.msra.mxu0 %v1222_v24 }
  0xf6   : > { %469 = vrot.lane.b32.xlu1 %v1220_v28, %s1669_s30  ;;  %464 = vrot.lane.b32.xlu0 %v1219_v29, %s1670_s16  ;;  %s1553_s16 = scalar_lea.vmem %s1052_s5, 64 }
  0xf7   : > { %1276 = vmatprep.subr.bf16.mxu0 %v1666_v0  ;;  %p1554_p7 = scmp.ne.s32.totalorder %s1052_s5, %s1553_s16 }
  0xf8   : > { %1267 = vmatmul.mubr.msk.bf16.vlgmr.msra.gmra.mxu0 %vm376_vm3, %v1433_v30 }
  0xf9   : > { %1278 = vmatprep.mubr.msk.bf16.mxu0 %vm1668_vm11, %v1666_v0  ;;  %p1555_p9 = pnand %p1554_p7, %p2066_p4 }
  0xfa   : > { %471 = vrot.lane.b32.xlu0 %v1219_v29, %s1669_s30  ;;  %446 = vrot.lane.b32.xlu1 %v1217_v33, %s1671_s26  ;;  %s1036_s30 = scalar_lea.sflag [#allocation5], %s1895_s27 }
  0xfb   : > { %p1556_p0 = pneg %p1555_p9 }
  0xfe   : > { %448 = vrot.lane.b32.xlu0 %v1218_v34, %s1671_s26  ;;  %453 = vrot.lane.b32.xlu1 %v1217_v33, %s1672_s9  ;;  %s1557_s26 = sshll.u32 %s1676_s21, 4  ;;  %s1558_s26 = int_to_ptr.vmem [resolvable:$false] %s1557_s26 }
  0xff   : > { %s1559_s9 = scalar_lea.vmem %s1558_s26, 128  ;;  %p1560_p6 = scmp.lt.s32.totalorder %s1052_s5, %s1558_s26 }
 0x100   : > { %p1561_p10 = scmp.lt.s32.totalorder %s1559_s9, %s1553_s16 }
 0x102   : > { %p1562_p1 = por %p1561_p10, %p1560_p6 }
 0x104   : > { %p1563_p13 = pnand %p1562_p1, %p1556_p0 }
 0x168   : > { %v470_v35 = vpop.permute.xlu1 %469  ;;  %v465_v36 = vpop.permute.xlu0 %464 }
 0x169   : > { %v478_v37 = vsel %vm473_vm13, %v465_v36, %v470_v35 }
 0x16a   : > { %1271 = vmatpush3.bf16.msra.mxu1 %v478_v37  ;;  %653 = vrot.lane.b32.xlu0 %v478_v37, %s1673_s10 }
 0x16b   : > { %1282 = vmatprep.subr.bf16.mxu1 %v1666_v0 }
 0x16c   : > { %v472_v39 = vpop.permute.xlu0 %471  ;;  %v447_v40 = vpop.permute.xlu1 %446 }
 0x16d   : > { %v474_v41 = vsel %vm473_vm13, %v470_v35, %v472_v39  ;;  %1273 = vmatmul.mubr.msk.bf16.vlgmr.msra.gmra.mxu1 %vm376_vm3, %v1435_v38 }
 0x16e   : > { %717 = vrot.lane.b32.xlu0 %v1222_v24, %s1673_s10  ;;  %655 = vrot.lane.b32.xlu1 %v474_v41, %s1673_s10 }
 0x16f   : > { %1284 = vmatprep.mubr.msk.bf16.mxu1 %vm1668_vm11, %v1666_v0 }
 0x170   : > { %v449_v42 = vpop.permute.xlu0 %448  ;;  %v454_v44 = vpop.permute.xlu1 %453 }
 0x171   : > { %v451_v43 = vsel %vm450_vm14, %v447_v40, %v449_v42  ;;  %v458_v46 = vsel %vm455_vm15, %v449_v42, %v454_v44 }
 0x172   : > { %719 = vrot.lane.b32.xlu1 %v1231_v27, %s1673_s10  ;;  %778 = vrot.lane.b32.xlu0 %v451_v43, %s1673_s10 }
 0x173   : > { %1277 = vmatpush3.bf16.msra.mxu0 %v451_v43 }
 0x174   : > { %1288 = vmatprep.subr.bf16.mxu0 %v1666_v0 }
 0x176   : > { %838 = vrot.lane.b32.xlu0 %v478_v37, %s1674_s1  ;;  %780 = vrot.lane.b32.xlu1 %v458_v46, %s1673_s10 }
 0x177   : > { %1279 = vmatmul.mubr.msk.bf16.vlgmr.msra.gmra.mxu0 %vm376_vm3, %v1436_v45 }
 0x178   : > { %1290 = vmatprep.mubr.msk.bf16.mxu0 %vm1668_vm11, %v1666_v0 }
 0x17a   : > { %899 = vrot.lane.b32.xlu0 %v1222_v24, %s1674_s1  ;;  %840 = vrot.lane.b32.xlu1 %v474_v41, %s1674_s1 }
 0x17e   : > { %959 = vrot.lane.b32.xlu0 %v451_v43, %s1674_s1  ;;  %901 = vrot.lane.b32.xlu1 %v1231_v27, %s1674_s1 }
 0x182   : > { %961 = vrot.lane.b32.xlu1 %v458_v46, %s1674_s1  ;;  %1015 = vperm.xlu0 %1430, %v1011_v48  }
 0x186   : > { %1020 = vperm.xlu1 %1431, %v1012_v49  }
 0x1b8   : > { %v534_v50 = vpop.f32.mrf.mxu0 }
 0x1ba   : > { %v1268_v51 = vpop.f32.mrf.mxu0 }
 0x1bc   : > { %v537_v52 = vpop.f32.mrf.mxu0 }
 0x1be   : > { %v1269_v53 = vpop.f32.mrf.mxu0 }
 0x1dc   : > { %v654_v54 = vpop.permute.xlu0 %653 }
 0x1e0   : > { %v718_v55 = vpop.permute.xlu0 %717  ;;  %v656_v56 = vpop.permute.xlu1 %655 }
 0x1e1   : > { %v658_v57 = vsel %vm657_vm0, %v654_v54, %v656_v56 }
 0x1e2   : > { %1283 = vmatpush3.bf16.msra.mxu1 %v658_v57 }
 0x1e3   : > { %1294 = vmatprep.subr.bf16.mxu1 %v1666_v0 }
 0x1e4   : > { %v779_v59 = vpop.permute.xlu0 %778  ;;  %v720_v60 = vpop.permute.xlu1 %719 }
 0x1e5   : > { %v721_v61 = vsel %vm657_vm0, %v718_v55, %v720_v60  ;;  %1285 = vmatmul.mubr.msk.bf16.vlgmr.msra.gmra.mxu1 %vm376_vm3, %v1437_v58 }
 0x1e6   : > { %1289 = vmatpush3.bf16.msra.mxu0 %v721_v61  ;;  %1296 = vmatprep.mubr.msk.bf16.mxu1 %vm1668_vm11, %v1666_v0 }
 0x1e7   : > { %1300 = vmatprep.subr.bf16.mxu0 %v1666_v0 }
 0x1e8   : > { %v839_v63 = vpop.permute.xlu0 %838  ;;  %v781_v1 = vpop.permute.xlu1 %780 }
 0x1e9   : > { %v782_v2 = vsel %vm657_vm0, %v779_v59, %v781_v1  ;;  %1291 = vmatmul.mubr.msk.bf16.vlgmr.msra.gmra.mxu0 %vm376_vm3, %v1438_v62 }
 0x1ea   : > { %1295 = vmatpush3.bf16.msra.mxu1 %v782_v2  ;;  %1302 = vmatprep.mubr.msk.bf16.mxu0 %vm1668_vm11, %v1666_v0 }
 0x1eb   : > { %1306 = vmatprep.subr.bf16.mxu1 %v1666_v0 }
 0x1ec   : > { %v841_v4 = vpop.permute.xlu1 %840  ;;  %v900_v7 = vpop.permute.xlu0 %899 }
 0x1ed   : > { %v843_v5 = vsel %vm842_vm1, %v839_v63, %v841_v4  ;;  %1297 = vmatmul.mubr.msk.bf16.vlgmr.msra.gmra.mxu1 %vm376_vm3, %v1439_v3 }
 0x1ee   : > { %1301 = vmatpush3.bf16.msra.mxu0 %v843_v5  ;;  %1308 = vmatprep.mubr.msk.bf16.mxu1 %vm1668_vm11, %v1666_v0 }
 0x1ef   : > { %1312 = vmatprep.subr.bf16.mxu0 %v1666_v0 }
 0x1f0   : > { %v902_v8 = vpop.permute.xlu1 %901  ;;  %v960_v11 = vpop.permute.xlu0 %959 }
 0x1f1   : > { %v903_v9 = vsel %vm842_vm1, %v900_v7, %v902_v8  ;;  %1303 = vmatmul.mubr.msk.bf16.vlgmr.msra.gmra.mxu0 %vm376_vm3, %v1440_v6 }
 0x1f2   : > { %1307 = vmatpush3.bf16.msra.mxu1 %v903_v9  ;;  %1314 = vmatprep.mubr.msk.bf16.mxu0 %vm1668_vm11, %v1666_v0 }
 0x1f4   : > { %v962_v12 = vpop.permute.xlu1 %961 }
 0x1f5   : > { %v963_v13 = vsel %vm842_vm1, %v960_v11, %v962_v12  ;;  %1309 = vmatmul.mubr.msk.bf16.vlgmr.msra.gmra.mxu1 %vm376_vm3, %v1441_v10 }
 0x1f6   : > { %1313 = vmatpush3.bf16.msra.mxu0 %v963_v13 }
 0x1f9   : > { %1315 = vmatmul.mubr.msk.bf16.vlgmr.msra.gmra.mxu0 %vm376_vm3, %v1442_v14 }
 0x201   : > { %v1021_v62 = vpop.permute.xlu1 %1020 }
 0x22d   : > { %v583_v15 = vpop.f32.mrf.mxu1 }
 0x22e   : > { %v584_v19 = vadd.f32 %v583_v15, %v534_v50 }
 0x22f   : > { %v1274_v16 = vpop.f32.mrf.mxu1 }
 0x231   : > { %v586_v17 = vpop.f32.mrf.mxu1 }
 0x232   : > { %v587_v22 = vadd.f32 %v586_v17, %v537_v52  ;;  %v1016_v52 = vpop.permute.xlu0 %1015 }
 0x233   : > { %v1275_v18 = vpop.f32.mrf.mxu1 }
 0x237   : > { %v635_v20 = vpop.f32.mrf.mxu0 }
 0x238   : > { %v642_v21 = vadd.f32 %v635_v20, %v584_v19 }
 0x239   : > { %v1280_v23 = vpop.f32.mrf.mxu0 }
 0x23b   : > { %v638_v0 = vpop.f32.mrf.mxu0 }
 0x23c   : > { %v643_v24 = vadd.f32 %v638_v0, %v587_v22 }
 0x23d   : > { %v1281_v25 = vpop.f32.mrf.mxu0 }
 0x2a5   : > { %v697_v26 = vpop.f32.mrf.mxu1 }
 0x2a6   : > { %v704_v36 = vadd.f32 %v697_v26, %v642_v21 }
 0x2a7   : > { %v1286_v27 = vpop.f32.mrf.mxu1 }
 0x2a9   : > { %v700_v28 = vpop.f32.mrf.mxu1  ;;  %v760_v29 = vpop.f32.mrf.mxu0 }
 0x2aa   : > { %v767_v39 = vadd.f32 %v760_v29, %v704_v36  ;;  %v705_v42 = vadd.f32 %v700_v28, %v643_v24 }
 0x2ab   : > { %v1287_v30 = vpop.f32.mrf.mxu1  ;;  %v1292_v31 = vpop.f32.mrf.mxu0 }
 0x2ad   : > { %v763_v32 = vpop.f32.mrf.mxu0  ;;  %v821_v33 = vpop.f32.mrf.mxu1 }
 0x2ae   : > { %v828_v43 = vadd.f32 %v821_v33, %v767_v39  ;;  %v768_v46 = vadd.f32 %v763_v32, %v705_v42 }
 0x2af   : > { %v1293_v34 = vpop.f32.mrf.mxu0  ;;  %v1298_v35 = vpop.f32.mrf.mxu1 }
 0x2b1   : > { %v824_v37 = vpop.f32.mrf.mxu1  ;;  %v882_v38 = vpop.f32.mrf.mxu0 }
 0x2b2   : > { %v889_v47 = vadd.f32 %v882_v38, %v828_v43  ;;  %v829_v50 = vadd.f32 %v824_v37, %v768_v46 }
 0x2b3   : > { %v1299_v40 = vpop.f32.mrf.mxu1  ;;  %v1304_v41 = vpop.f32.mrf.mxu0 }
 0x2b5   : > { %v885_v44 = vpop.f32.mrf.mxu0  ;;  %v942_v45 = vpop.f32.mrf.mxu1 }
 0x2b6   : > { %v949_v51 = vadd.f32 %v942_v45, %v889_v47  ;;  %v890_v55 = vadd.f32 %v885_v44, %v829_v50 }
 0x2b7   : > { %v1305_v48 = vpop.f32.mrf.mxu0  ;;  %v1310_v49 = vpop.f32.mrf.mxu1 }
 0x2b9   : > { %v945_v53 = vpop.f32.mrf.mxu1  ;;  %v1002_v54 = vpop.f32.mrf.mxu0 }
 0x2ba   : > { %v1009_v56 = vadd.f32 %v1002_v54, %v949_v51  ;;  %v950_v59 = vadd.f32 %v945_v53, %v890_v55 }
 0x2bb   : > { %v1316_v57 = vpop.f32.mrf.mxu0  ;;  %v1311_v58 = vpop.f32.mrf.mxu1 }
 0x2bc   : > { %v1023_v60 = vadd.f32 %v1016_v52, %v1009_v56 }
 0x2bd   : > { %v1005_v61 = vpop.f32.mrf.mxu0 }
 0x2be   : > { %v1026_v63 = vrot.slane %v1023_v60, 4  ;;  %v1010_v1 = vadd.f32 %v1005_v61, %v950_v59 }
 0x2bf   : > { %v1317_v2 = vpop.f32.mrf.mxu0 }
 0x2c0   : > { %v1028_v3 = vmul.f32 %v1026_v63, %v1023_v60  ;;  %v1024_v4 = vadd.f32 %v1021_v62, %v1010_v1 }
 0x2c2   : > { %v1029_v5 = vmul.f32 %v1028_v3, %v1024_v4  ;;  %v1031_v6 = vrot.slane %v1024_v4, 4 }
 0x2c4   : > { %v1033_v7 = vmul.f32 %v1031_v6, %v1029_v5 }
 0x2c6   : > { %1034 = vst [vmem:[%s359_s2] sm:$0xf] %v1033_v7 }
 0x2c7   : > { %1566 = shalt.err (!%p1563_p13)
}
 0x2c8   : > { %s1567_s10 = scalar_lea.hbm %s1049_s6, 64  ;;  %s1571_s14 = scalar_lea.hbm %s2065_s11, 256 }
 0x2c9   : > { %p1568_p8 = scmp.ne.s32.totalorder %s1049_s6, %s1567_s10  ;;  %p1572_p2 = scmp.lt.s32.totalorder %s1049_s6, %s2065_s11 }
 0x2ca   : > { %p1573_p3 = scmp.lt.s32.totalorder %s1571_s14, %s1567_s10 }
 0x2cb   : > { %p1569_p11 = pnand %p1568_p8, %p2066_p4 }
 0x2cc   : > { %p1574_p5 = por %p1573_p3, %p1572_p2 }
 0x2cd   : > { %p1570_p12 = pneg %p1569_p11 }
 0x2cf   : > { %p1575_p7 = pnand %p1574_p5, %p1570_p12 }
 0x2d1   : > { %1578 = shalt.err (!%p1575_p7)
}
 0x2d2   : > { %1328 = dma.vmem_to_hbm [thread:$0]  (%p2066_p4), %s1052_s5, 64, %s1049_s6, %s1036_s30  }
 0x2d3 PF: > { %p1351_p9 = scmp.ge.s32.totalorder %s1657_s25, 2  ;;  %s1063_s23 = sand.u32 1, %s1629_s18  }
 0x2d4   : > { %p2067_p0 = scmp.ne.s32.totalorder %s2052_s29, 0  ;;  %s1064_s7 = scalar_lea.sflag [#allocation5], %s1063_s23 }
 0x2d6   : > { %p1345_p6 = pnand %p1351_p9, %p2067_p0 }
 0x2d8   : > { %p1346_p10 = pneg %p1345_p6 }
 0x2da   : > { %1624 = dma.done.wait (%p1346_p10), %s1064_s7, 64  }
 0x2db   : > { %1626 = vsyncadd (%p1346_p10), %s1064_s7, 4294967232  ;;  %s25_s25 = sadd.s32 1, %s1657_s25   ;;  %s2068_s21 = sld [smem:[#allocation16_spill]] }
 0x2dc   : > { %p22_p1 = scmp.ge.s32.totalorder %s25_s25, 6   ;;  %s2069_s22 = sld [smem:[#allocation17_spill]] }
 0x2dd   : > { %s2070_s23 = sld [smem:[#allocation18_spill]]  ;;  %s2072_s18 = smov %s1633_s19 }
 0x2de   : > { %s2071_s24 = sld [smem:[#allocation19_spill]]  ;;  %s2073_s19 = smov %s1637_s20 }
 0x2df   : > { %s2074_s20 = smov %s1781_s13  ;;  %24 = sbr.rel (!%p22_p1) target bundleno = 15 (0xf), region = 121 }
 0x2e4   :  { %1069 = vsyncpa [#allocation4], 1 }
 0x2e5   :  { %1071 = vsyncpa [#allocation4 + $0x1], 1 }
 0x2e6   :  { %1072 = vsyncpa [#allocation7], 1 }
 0x2e7   :  { %1074 = vsyncpa [#allocation7 + $0x1], 1 }
 0x2e8   :  { %1075 = vsyncpa [#allocation10], 1 }
 0x2e9   :  { %1076 = vsyncpa [#allocation5], 1 }
 0x2ea   :  { %1078 = vsyncpa [#allocation5 + $0x1], 1 }

</bundles_post_ra>
